<compile_context>
chip_gen: v7x
topology: tpu7x:2x2x1
jax: 0.10.0
libtpu: 0.0.40
codegen_flags: <defaults>
</compile_context>

<pallas_src>
import functools
import math

import jax
import jax.numpy as jnp
from jax import lax
from jax.experimental import pallas as pl
from jax.experimental.pallas import tpu as pltpu


def _se_block_kernel(x_ref, w1_ref, w2_ref, o_ref, *, inv_hw):
    # x_ref : (TB, C, HW)   TB batch rows, channels on sublanes, HW on lanes
    # w1_ref: (hidden, C)   fc1 weight (PyTorch layout: out_features x in_features)
    # w2_ref: (C, hidden)   fc2 weight
    # o_ref : (TB, C, HW)
    x = x_ref[...]                                                # native I/O dtype

    # Squeeze: global average pool over the lane (spatial) axis, f32 accumulate.
    pooled = jnp.sum(x.astype(jnp.float32), axis=2) * inv_hw      # (TB, C)

    # Excite: batched row-major FCs on the MXU, contracting the channel axis of
    # the (out, in)-layout weights directly (no transposes).
    w1 = w1_ref[...].astype(jnp.float32)                          # (hidden, C)
    w2 = w2_ref[...].astype(jnp.float32)                          # (C, hidden)
    y1 = lax.dot_general(pooled, w1, (((1,), (1,)), ((), ())),
                         preferred_element_type=jnp.float32)      # (TB, hidden)
    y1 = jnp.maximum(y1, 0.0)                                     # ReLU
    y2 = lax.dot_general(y1, w2, (((1,), (1,)), ((), ())),
                         preferred_element_type=jnp.float32)      # (TB, C)
    scale = jax.nn.sigmoid(y2)                                    # EUP exp + recip

    # Rescale: per-(batch, channel) scale broadcast across the lane-dense
    # spatial axis, in the I/O dtype (bf16 stays on the bf16 VALU on v6e/v7x).
    o_ref[...] = x * scale.astype(x.dtype)[:, :, None]


def _choose_block_batch(batch, per_batch_bytes,
                        target_bytes=2 << 20, cap_bytes=4 << 20):
    """Largest batch-tile that (a) divides `batch` (no partial blocks) and
    (b) keeps the input block around a few MiB to amortize per-step overhead."""
    if batch * per_batch_bytes <= cap_bytes:
        return batch                     # whole batch in a single block
    best = 1
    for tb in range(1, batch + 1):
        if batch % tb == 0 and tb * per_batch_bytes <= target_bytes:
            best = tb
    return best


def se_block(x_nchw, fc1_weight, fc2_weight, *, block_batch=None,
             core_parallel=False):
    """SEBlock forward.

    x_nchw:     (B, C, H, W)
    fc1_weight: (C // reduction, C)   -- nn.Linear(C, C//r, bias=False).weight
    fc2_weight: (C, C // reduction)   -- nn.Linear(C//r, C, bias=False).weight
    returns:    (B, C, H, W), same dtype as x
    """
    B, C, H, W = x_nchw.shape
    hidden = fc1_weight.shape[0]
    HW = H * W

    x_flat = x_nchw.reshape(B, C, HW)   # free reshape, stays NCHW-contiguous

    per_batch_bytes = C * HW * x_nchw.dtype.itemsize
    if block_batch is None:
        tb = _choose_block_batch(B, per_batch_bytes)
    else:
        tb = max(1, min(int(block_batch), B))
        while B % tb != 0:              # keep blocks exact (no tail block)
            tb -= 1
    num_blocks = pl.cdiv(B, tb)

    kernel = functools.partial(_se_block_kernel, inv_hw=1.0 / float(HW))

    batch_sem = pltpu.CORE_PARALLEL if core_parallel else "parallel"

    out_flat = pl.pallas_call(
        kernel,
        out_shape=jax.ShapeDtypeStruct((B, C, HW), x_nchw.dtype),
        grid=(num_blocks,),
        in_specs=[
            # Last two block dims == full array dims, so any C / HW is legal.
            pl.BlockSpec((tb, C, HW), lambda b: (b, 0, 0)),
            pl.BlockSpec((hidden, C), lambda b: (0, 0)),   # VMEM-resident
            pl.BlockSpec((C, hidden), lambda b: (0, 0)),   # VMEM-resident
        ],
        out_specs=pl.BlockSpec((tb, C, HW), lambda b: (b, 0, 0)),
        compiler_params=pltpu.CompilerParams(
            dimension_semantics=(batch_sem,),
            vmem_limit_bytes=32 << 20,
        ),
    )(x_flat, fc1_weight, fc2_weight)

    return out_flat.reshape(B, C, H, W)


def _se_block_reference(x, fc1_w, fc2_w):
    """Pure-JAX reference with identical semantics to the PyTorch module (f32)."""
    xf = x.astype(jnp.float32)
    pooled = jnp.mean(xf, axis=(2, 3))                             # (B, C)
    y = jnp.maximum(pooled @ fc1_w.astype(jnp.float32).T, 0.0)     # (B, hidden)
    y = jax.nn.sigmoid(y @ fc2_w.astype(jnp.float32).T)            # (B, C)
    return xf * y[:, :, None, None]


if __name__ == "__main__":
    # reduction=16 requires C divisible by 16; pick C=64 -> hidden=4.
    C, H, W = 64, 16, 16
    reduction = 16
    hidden = C // reduction

    key = jax.random.PRNGKey(0)
    kx1, kx2, k1, k2 = jax.random.split(key, 4)

    # Deterministic PyTorch-style nn.Linear init: U(-1/sqrt(fan_in), 1/sqrt(fan_in)).
    b1 = 1.0 / math.sqrt(C)
    b2 = 1.0 / math.sqrt(hidden)
    fc1_w = jax.random.uniform(k1, (hidden, C), jnp.float32, -b1, b1)
    fc2_w = jax.random.uniform(k2, (C, hidden), jnp.float32, -b2, b2)

    # --- Test 1: shipped benchmark size, whole batch in a single block. ---
    B = 2
    x = jax.random.normal(kx1, (B, C, H, W), dtype=jnp.float32)
    out = jax.block_until_ready(se_block(x, fc1_w, fc2_w))
    ref = _se_block_reference(x, fc1_w, fc2_w)
    assert out.shape == (B, C, H, W)
    assert jnp.allclose(out, ref, atol=1e-5, rtol=1e-5), "f32 single-block mismatch"

    # --- Test 2: larger batch with a forced smaller batch tile (grid > 1). ---
    B2 = 8
    x2 = jax.random.normal(kx2, (B2, C, H, W), dtype=jnp.float32)
    out2 = jax.block_until_ready(se_block(x2, fc1_w, fc2_w, block_batch=2))
    ref2 = _se_block_reference(x2, fc1_w, fc2_w)
    assert jnp.allclose(out2, ref2, atol=1e-5, rtol=1e-5), "f32 blocked-grid mismatch"

    # --- Test 3: bf16-stored activations (halved HBM traffic on v6e/v7x). ---
    x2_bf16 = x2.astype(jnp.bfloat16)
    out3 = jax.block_until_ready(se_block(x2_bf16, fc1_w, fc2_w, block_batch=4))
    ref3 = _se_block_reference(x2_bf16, fc1_w, fc2_w)
    assert out3.dtype == jnp.bfloat16
    assert jnp.allclose(out3.astype(jnp.float32), ref3, atol=2e-2, rtol=2e-2), \
        "bf16 mismatch"

    print("KERNEL_OK")
</pallas_src>

<mosaic_0001>
module attributes {stable_mosaic.version = 11 : i64} {
  func.func @_se_block_kernel(%arg0: i32, %arg1: memref<2x64x256xf32, #tpu.memory_space<vmem>>, %arg2: memref<4x64xf32, #tpu.memory_space<vmem>>, %arg3: memref<64x4xf32, #tpu.memory_space<vmem>>, %arg4: memref<2x64x256xf32, #tpu.memory_space<vmem>>) attributes {dimension_semantics = [#tpu.dimension_semantics<parallel>], iteration_bounds = array<i64: 1>, scalar_prefetch = 0 : i64, scratch_operands = 0 : i64, tpu.core_type = #tpu.core_type<tc>, window_params = [{transform_indices = @transform_0, window_bounds = array<i64: 2, 64, 256>}, {pipeline_mode = #tpu.pipeline_mode<synchronous>, transform_indices = @transform_1, window_bounds = array<i64: 4, 64>}, {pipeline_mode = #tpu.pipeline_mode<synchronous>, transform_indices = @transform_2, window_bounds = array<i64: 64, 4>}, {transform_indices = @transform_3, window_bounds = array<i64: 2, 64, 256>}]} {
    %c0 = arith.constant 0 : index
    %c0_0 = arith.constant 0 : index
    %c0_1 = arith.constant 0 : index
    %0 = vector.load %arg1[%c0, %c0_0, %c0_1] : memref<2x64x256xf32, #tpu.memory_space<vmem>>, vector<2x64x256xf32>
    %cst = arith.constant dense<0.000000e+00> : vector<2x64xf32>
    %1 = vector.multi_reduction <add>, %0, %cst [2] : vector<2x64x256xf32> to vector<2x64xf32>
    %cst_2 = arith.constant 3.906250e-03 : f32
    %2 = vector.broadcast %cst_2 : f32 to vector<2x64xf32>
    %3 = arith.mulf %1, %2 : vector<2x64xf32>
    %c0_3 = arith.constant 0 : index
    %c0_4 = arith.constant 0 : index
    %4 = vector.load %arg2[%c0_3, %c0_4] : memref<4x64xf32, #tpu.memory_space<vmem>>, vector<4x64xf32>
    %c0_5 = arith.constant 0 : index
    %c0_6 = arith.constant 0 : index
    %5 = vector.load %arg3[%c0_5, %c0_6] : memref<64x4xf32, #tpu.memory_space<vmem>>, vector<64x4xf32>
    %cst_7 = arith.constant dense<0.000000e+00> : vector<2x4xf32>
    %6 = tpu.matmul %3, %4, %cst_7 {dimension_numbers = #tpu.dot_dimension_numbers<[1], [1], [0], [0], [0, 0, 1, 0], [], []>} : vector<2x64xf32>, vector<4x64xf32>, vector<2x4xf32> -> vector<2x4xf32>
    %cst_8 = arith.constant 0.000000e+00 : f32
    %7 = vector.broadcast %cst_8 : f32 to vector<2x4xf32>
    %8 = arith.maximumf %6, %7 : vector<2x4xf32>
    %cst_9 = arith.constant dense<0.000000e+00> : vector<2x64xf32>
    %9 = tpu.matmul %8, %5, %cst_9 {dimension_numbers = #tpu.dot_dimension_numbers<[1], [1], [0], [0], [0, 0, 1, 0], [], []>} : vector<2x4xf32>, vector<64x4xf32>, vector<2x64xf32> -> vector<2x64xf32>
    %10 = arith.negf %9 : vector<2x64xf32>
    %11 = math.exp %10 : vector<2x64xf32>
    %cst_10 = arith.constant 1.000000e+00 : f32
    %12 = vector.broadcast %cst_10 : f32 to vector<2x64xf32>
    %13 = arith.addf %12, %11 : vector<2x64xf32>
    %14 = arith.divf %12, %13 : vector<2x64xf32>
    %15 = vector.shape_cast %14 : vector<2x64xf32> to vector<2x64x1xf32>
    %16 = vector.broadcast %15 : vector<2x64x1xf32> to vector<2x64x256xf32>
    %17 = arith.mulf %0, %16 : vector<2x64x256xf32>
    %c0_11 = arith.constant 0 : index
    %c0_12 = arith.constant 0 : index
    %c0_13 = arith.constant 0 : index
    %18 = vector.load %arg4[%c0_11, %c0_12, %c0_13] : memref<2x64x256xf32, #tpu.memory_space<vmem>>, vector<2x64x256xf32>
    tpu.vector_store %arg4[%c0_11, %c0_12, %c0_13], %17 {strides = array<i32>} : memref<2x64x256xf32, #tpu.memory_space<vmem>>, vector<2x64x256xf32>,
    return
  }
  func.func @transform_0(%arg0: i32) -> (i32, i32, i32) {
    %c0_i32 = arith.constant 0 : i32
    %c0_i32_0 = arith.constant 0 : i32
    %c0_i32_1 = arith.constant 0 : i32
    return %arg0, %c0_i32, %c0_i32_0 : i32, i32, i32
  }
  func.func @transform_1(%arg0: i32) -> (i32, i32) {
    %c0_i32 = arith.constant 0 : i32
    %c0_i32_0 = arith.constant 0 : i32
    %c0_i32_1 = arith.constant 0 : i32
    return %c0_i32, %c0_i32_0 : i32, i32
  }
  func.func @transform_2(%arg0: i32) -> (i32, i32) {
    %c0_i32 = arith.constant 0 : i32
    %c0_i32_0 = arith.constant 0 : i32
    %c0_i32_1 = arith.constant 0 : i32
    return %c0_i32, %c0_i32_0 : i32, i32
  }
  func.func @transform_3(%arg0: i32) -> (i32, i32, i32) {
    %c0_i32 = arith.constant 0 : i32
    %c0_i32_0 = arith.constant 0 : i32
    %c0_i32_1 = arith.constant 0 : i32
    return %arg0, %c0_i32, %c0_i32_0 : i32, i32, i32
  }
}

</mosaic_0001>

<bundles_post_ra>
// kernel: tpu_custom_call.1
= control target key start
LH: loop header
LB: loop body
LE: loop exit
PB: predicated region body
PF: predicated region fallthrough
CT: control target
= control target key end

     0   :  { %8 = vsyncpa [#allocation3], 0  ;;  %s953_s0 = inlined_call_operand.hbm [shape: f32[2,64,256], index: 0, kind: input, shape index: {}]   ;;  %s954_s1 = inlined_call_operand.vmem [shape: f32[4,64], index: 1, kind: input, shape index: {}]   ;;  %s955_s2 = inlined_call_operand.vmem [shape: f32[64,4], index: 2, kind: input, shape index: {}]   ;;  %s956_s3 = inlined_call_operand.hbm [shape: f32[2,64,256], index: 3, kind: output, shape index: {}]  }
   0x1   :  { %9 = vsyncpa [#allocation4], 0  ;;  %s700_s12 = smov [#allocation2]   ;;  %s652_s16 = scalar_lea.hbm %s953_s0, 4096 }
   0x2   :  { %s15_s13 = sshll.u32 %s700_s12, 4  ;;  %p653_p0 = scmp.ne.s32.totalorder %s953_s0, %s652_s16  ;;  %s16_s13 = int_to_ptr.vmem [resolvable:$true] %s15_s13 }
   0x3   :  { %p656_p1 = scmp.lt.u32.totalorder %s652_s16, %s953_s0 }
   0x5   :  { %p658_p2 = pnand %p656_p1, %p653_p0 }
   0x7   :  { %661 = shalt.err (!%p658_p2)
}
   0x8   :  { %s662_s21 = scalar_lea.vmem %s16_s13, 4096  ;;  %p667_p4 = scmp.lt.s32.totalorder %s16_s13, %s16_s13 }
   0x9   :  { %p663_p3 = scmp.ne.s32.totalorder %s16_s13, %s662_s21  ;;  %p668_p5 = scmp.lt.s32.totalorder %s662_s21, %s662_s21 }
   0xb   :  { %p669_p6 = por %p668_p5, %p667_p4 }
   0xd   :  { %p670_p7 = pnand %p669_p6, %p663_p3 }
   0xf   :  { %673 = shalt.err (!%p670_p7)
}
  0x10   :  { %s701_s22 = smov 256   ;;  %s702_s23 = smov 16  }
  0x11   :  { %21 = dma.hbm_to_vmem [thread:$0]  %s953_s0, 4096, %s16_s13, [#allocation3], %s701_s22, %s701_s22, %s702_s23  }
  0x12   :  { %696 = dma.done.wait [#allocation3], 4096  }
  0x13   :  { %697 = vsyncadd [#allocation3], 4294963200  ;;  %v742_v0 = vld [vmem:[#allocation2 + $0x80] sm:$0xff]  ;;  %v744_v1 = vld [vmem:[#allocation2 + $0x88] sm:$0xff]  ;;  %v703_v48 = vmov 0.0   ;;  %vm246_vm0 = vcmask 523264  }
  0x14   :  { %v746_v2 = vld [vmem:[#allocation2] sm:$0xff]  ;;  %v85_v3 = vadd.f32 %v744_v1, %v742_v0  ;;  %v750_v4 = vld [vmem:[#allocation2 + $0x8] sm:$0xff]  ;;  %v752_v5 = vld [vmem:[#allocation2 + $0x90] sm:$0xff]  ;;  %601 = vmatprep.subr.mxu0 %v703_v48  ;;  %vm704_vm1 = vmmov 0   ;;  %vm323_vm2 = vcmask 31744   ;;  %v705_v52 = vmov 0.0|0.0  }
  0x15   :  { %v754_v6 = vld [vmem:[#allocation2 + $0x98] sm:$0xff]  ;;  %v61_v7 = vadd.f32 %v750_v4, %v746_v2  ;;  %v758_v8 = vld [vmem:[#allocation2 + $0x10] sm:$0xff]  ;;  %v766_v12 = vld [vmem:[#allocation2 + $0xa0] sm:$0xff]  ;;  %603 = vmatprep.mubr.msk.f32.mxu0 %vm704_vm1, %v703_v48  ;;  %622 = vmatprep.mubr.msk.f32.mxu1 %vm704_vm1, %v703_v48  ;;  %vm161_vm4 = vcmask 130112   ;;  %vm168_vm5 = vcmask 195712   ;;  %vm175_vm6 = vcmask 261312  }
  0x16   :  { %v760_v9 = vld [vmem:[#allocation2 + $0x18] sm:$0xff]  ;;  %86 = vadd.xlane.f32.xlu1 %v85_v3  ;;  %v88_v10 = vadd.f32 %v754_v6, %v752_v5  ;;  %v768_v13 = vld [vmem:[#allocation2 + $0xa8] sm:$0xff]  ;;  %v770_v14 = vld [vmem:[#allocation2 + $0x20] sm:$0xff]  ;;  %625 = vmatprep.subr.bf16.mxu1 %v705_v52  ;;  %vm182_vm7 = vcmask 326912   ;;  %vm189_vm8 = vcmask 392512   ;;  %vm196_vm9 = vcmask 458112  }
  0x17   :  { %62 = vadd.xlane.f32.xlu0 %v61_v7  ;;  %v64_v11 = vadd.f32 %v760_v9, %v758_v8  ;;  %v772_v15 = vld [vmem:[#allocation2 + $0x28] sm:$0xff]  ;;  %v91_v16 = vadd.f32 %v768_v13, %v766_v12  ;;  %v778_v18 = vld [vmem:[#allocation2 + $0xb0] sm:$0xff]  ;;  %v780_v19 = vld [vmem:[#allocation2 + $0xb8] sm:$0xff]  ;;  %vm203_vm10 = vcmask 523712   ;;  %vm244_vm11 = vcmask 1041409  }
  0x18   :  { %v67_v17 = vadd.f32 %v772_v15, %v770_v14  ;;  %964 = vst [vmem:[#allocation8_spill] sm:$0xff] %v780_v19  ;;  %v782_v20 = vld [vmem:[#allocation2 + $0x30] sm:$0xff]  ;;  %v784_v21 = vld [vmem:[#allocation2 + $0x38] sm:$0xff]  ;;  %v94_v22 = vadd.f32 %v780_v19, %v778_v18  ;;  %v790_v24 = vld [vmem:[#allocation2 + $0xc0] sm:$0xff] }
  0x19   :  { %v70_v23 = vadd.f32 %v784_v21, %v782_v20  ;;  %v792_v25 = vld [vmem:[#allocation2 + $0xc8] sm:$0xff]  ;;  %v794_v26 = vld [vmem:[#allocation2 + $0x40] sm:$0xff]  ;;  %v802_v30 = vld [vmem:[#allocation2 + $0xd0] sm:$0xff] }
  0x1a   :  { %89 = vadd.xlane.f32.xlu1 %v88_v10  ;;  %v796_v27 = vld [vmem:[#allocation2 + $0x48] sm:$0xff]  ;;  %v97_v28 = vadd.f32 %v792_v25, %v790_v24  ;;  %965 = vst [vmem:[#allocation9_spill] sm:$0xff] %v802_v30  ;;  %v804_v31 = vld [vmem:[#allocation2 + $0xd8] sm:$0xff]  ;;  %v806_v32 = vld [vmem:[#allocation2 + $0x50] sm:$0xff] }
  0x1b   :  { %65 = vadd.xlane.f32.xlu0 %v64_v11  ;;  %v73_v29 = vadd.f32 %v796_v27, %v794_v26  ;;  %966 = vst [vmem:[#allocation10_spill] sm:$0xff] %v804_v31  ;;  %v808_v33 = vld [vmem:[#allocation2 + $0x58] sm:$0xff]  ;;  %v100_v34 = vadd.f32 %v804_v31, %v802_v30  ;;  %v814_v36 = vld [vmem:[#allocation2 + $0xe0] sm:$0xff]  ;;  %v816_v37 = vld [vmem:[#allocation2 + $0xe8] sm:$0xff] }
  0x1c   :  { %v76_v35 = vadd.f32 %v808_v33, %v806_v32  ;;  %967 = vst [vmem:[#allocation11_spill] sm:$0xff] %v814_v36  ;;  %968 = vst [vmem:[#allocation12_spill] sm:$0xff] %v816_v37  ;;  %v818_v38 = vld [vmem:[#allocation2 + $0x60] sm:$0xff]  ;;  %v820_v39 = vld [vmem:[#allocation2 + $0x68] sm:$0xff]  ;;  %v103_v40 = vadd.f32 %v816_v37, %v814_v36 }
  0x1d   :  { %v79_v41 = vadd.f32 %v820_v39, %v818_v38  ;;  %v826_v42 = vld [vmem:[#allocation2 + $0xf0] sm:$0xff]  ;;  %v828_v43 = vld [vmem:[#allocation2 + $0xf8] sm:$0xff]  ;;  %v125_v49 = vld [vmem:[%s954_s1] sm:$0xf] }
  0x1e   :  { %92 = vadd.xlane.f32.xlu1 %v91_v16  ;;  %969 = vst [vmem:[#allocation13_spill] sm:$0xff] %v826_v42  ;;  %970 = vst [vmem:[#allocation14_spill] sm:$0xff] %v828_v43  ;;  %v830_v44 = vld [vmem:[#allocation2 + $0x70] sm:$0xff]  ;;  %v832_v45 = vld [vmem:[#allocation2 + $0x78] sm:$0xff]  ;;  %v106_v46 = vadd.f32 %v828_v43, %v826_v42  ;;  %602 = vmatpush3.xpose.msk.msra.mxu0 %vm246_vm0, %v125_v49  ;;  %v150_v16 = vlaneseq }
  0x1f   :  { %68 = vadd.xlane.f32.xlu0 %v67_v17  ;;  %v82_v47 = vadd.f32 %v832_v45, %v830_v44  ;;  %v126_v50 = vld [vmem:[%s955_s2] sm:$0xff]  ;;  %v127_v51 = vld [vmem:[%s955_s2 + $0x8] sm:$0xff]  ;;  %vm850_vm3 = vmpackc.low %vm323_vm2, %vm323_vm2 }
  0x20   :  { %v626_v53 = vpack.c.bf16 %v127_v51, %v126_v50  ;;  %v128_v55 = vld [vmem:[%s955_s2 + $0x10] sm:$0xff]  ;;  %v129_v56 = vld [vmem:[%s955_s2 + $0x18] sm:$0xff]  ;;  %v130_v58 = vld [vmem:[%s955_s2 + $0x20] sm:$0xff] }
  0x21   :  { %v630_v57 = vpack.c.bf16 %v129_v56, %v128_v55  ;;  %v131_v59 = vld [vmem:[%s955_s2 + $0x28] sm:$0xff]  ;;  %v132_v61 = vld [vmem:[%s955_s2 + $0x30] sm:$0xff]  ;;  %v133_v62 = vld [vmem:[%s955_s2 + $0x38] sm:$0xff]  ;;  %s706_s2 = smov [#allocation5]  }
  0x22   :  { %95 = vadd.xlane.f32.xlu1 %v94_v22  ;;  %628 = vmatpush3.bf16.xpose.msk.msra.mxu1 %vm850_vm3, %v626_v53  ;;  %v634_v60 = vpack.c.bf16 %v131_v59, %v130_v58  ;;  %v638_v63 = vpack.c.bf16 %v133_v62, %v132_v61  ;;  %s566_s15 = sshll.u32 %s706_s2, 4  ;;  %s567_s15 = int_to_ptr.vmem [resolvable:$true] %s566_s15 }
  0x23   :  { %71 = vadd.xlane.f32.xlu0 %v70_v23  ;;  %629 = vmatprep.subr.bf16.mxu1 %v705_v52  ;;  %v151_v23 = vand.u32 127, %v150_v16  ;;  %s674_s16 = scalar_lea.vmem %s567_s15, 4096  ;;  %p679_p9 = scmp.lt.s32.totalorder %s567_s15, %s567_s15 }
  0x24   :  { %p675_p8 = scmp.ne.s32.totalorder %s567_s15, %s674_s16  ;;  %p680_p10 = scmp.lt.s32.totalorder %s674_s16, %s674_s16 }
  0x25   :  { %v184_v48 = vadd.s32 4294967256, %v151_v23  ;;  %v191_v53 = vadd.s32 4294967248, %v151_v23 }
  0x26   :  { %98 = vadd.xlane.f32.xlu1 %v97_v28  ;;  %p681_p11 = por %p680_p10, %p679_p9 }
  0x27   :  { %74 = vadd.xlane.f32.xlu0 %v73_v29  ;;  %v880_v29 = vshrl.u32 %v150_v16, 7 }
  0x28   :  { %p682_p12 = pnand %p681_p11, %p675_p8 }
  0x29   :  { %v154_v49 = vsub.s32 %v151_v23, %v880_v29  ;;  %v187_v59 = vsub.s32 %v184_v48, %v880_v29 }
  0x2a   :  { %101 = vadd.xlane.f32.xlu1 %v100_v34  ;;  %632 = vmatpush3.bf16.xpose.msk.msra.mxu1 %vm850_vm3, %v630_v57 }
  0x2b   :  { %77 = vadd.xlane.f32.xlu0 %v76_v35  ;;  %633 = vmatprep.subr.bf16.mxu1 %v705_v52  ;;  %v156_v35 = vadd.s32 4294967288, %v151_v23 }
  0x2d   :  { %v159_v51 = vsub.s32 %v156_v35, %v880_v29 }
  0x2e   :  { %104 = vadd.xlane.f32.xlu1 %v103_v40  ;;  %v163_v40 = vadd.s32 4294967280, %v151_v23 }
  0x2f   :  { %80 = vadd.xlane.f32.xlu0 %v79_v41  ;;  %v170_v41 = vadd.s32 4294967272, %v151_v23 }
  0x31   :  { %v173_v55 = vsub.s32 %v170_v41, %v880_v29 }
  0x32   :  { %107 = vadd.xlane.f32.xlu1 %v106_v46  ;;  %636 = vmatpush3.bf16.xpose.msk.msra.mxu1 %vm850_vm3, %v634_v60  ;;  %v177_v46 = vadd.s32 4294967264, %v151_v23 }
  0x33   :  { %83 = vadd.xlane.f32.xlu0 %v82_v47  ;;  %637 = vmatprep.subr.bf16.mxu1 %v705_v52  ;;  %v166_v52 = vsub.s32 %v163_v40, %v880_v29 }
  0x34   :  { %v180_v56 = vsub.s32 %v177_v46, %v880_v29  ;;  %v198_v46 = vadd.s32 4294967240, %v151_v23 }
  0x36   :  { %v201_v23 = vsub.s32 %v198_v46, %v880_v29 }
  0x3a   :  { %640 = vmatpush3.bf16.xpose.msk.msra.mxu1 %vm850_vm3, %v638_v63 }
  0xa3   :  { %v87_v3 = vpop.xlane.xlu1 %86 }
  0xa4   :  { %v63_v7 = vpop.xlane.xlu0 %62  ;;  %v117_v61 = vmul.f32 0.00390625, %v87_v3 }
  0xa5   :  { %v109_v35 = vmul.f32 0.00390625, %v63_v7 }
  0xa6   :  { %v208_v37 = vrot.slane %v117_v61, %v154_v49 }
  0xa7   :  { %v90_v10 = vpop.xlane.xlu1 %89  ;;  %v155_v19 = vrot.slane %v109_v35, %v154_v49 }
  0xa8   :  { %v66_v11 = vpop.xlane.xlu0 %65  ;;  %v118_v54 = vmul.f32 0.00390625, %v90_v10  ;;  %v194_v10 = vsub.s32 %v191_v53, %v880_v29 }
  0xa9   :  { %v110_v57 = vmul.f32 0.00390625, %v66_v11 }
  0xaa   :  { %v212_v41 = vrot.slane %v118_v54, %v159_v51 }
  0xab   :  { %v93_v17 = vpop.xlane.xlu1 %92  ;;  %v160_v11 = vrot.slane %v110_v57, %v159_v51 }
  0xac   :  { %v69_v22 = vpop.xlane.xlu0 %68  ;;  %v119_v58 = vmul.f32 0.00390625, %v93_v17  ;;  %v213_v53 = vsel %vm161_vm4, %v212_v41, %v208_v37 }
  0xad   :  { %v111_v62 = vmul.f32 0.00390625, %v69_v22  ;;  %v162_v51 = vsel %vm161_vm4, %v160_v11, %v155_v19 }
  0xae   :  { %v217_v17 = vrot.slane %v119_v58, %v166_v52 }
  0xaf   :  { %v96_v28 = vpop.xlane.xlu1 %95  ;;  %v167_v3 = vrot.slane %v111_v62, %v166_v52 }
  0xb0   :  { %v72_v34 = vpop.xlane.xlu0 %71  ;;  %v120_v63 = vmul.f32 0.00390625, %v96_v28  ;;  %v218_v57 = vsel %vm168_vm5, %v217_v17, %v213_v53  ;;  %v464_v53 = vsub.s32 1, %v880_v29 }
  0xb1   :  { %v112_v40 = vmul.f32 0.00390625, %v72_v34  ;;  %v169_v61 = vsel %vm168_vm5, %v167_v3, %v162_v51 }
  0xb2   :  { %v222_v22 = vrot.slane %v120_v63, %v173_v55 }
  0xb3   :  { %v99_v47 = vpop.xlane.xlu1 %98  ;;  %v174_v7 = vrot.slane %v112_v40, %v173_v55 }
  0xb4   :  { %v75_v50 = vpop.xlane.xlu0 %74  ;;  %v121_v43 = vmul.f32 0.00390625, %v99_v47  ;;  %v223_v49 = vsel %vm175_vm6, %v222_v22, %v218_v57 }
  0xb5   :  { %v113_v42 = vmul.f32 0.00390625, %v75_v50  ;;  %v176_v37 = vsel %vm175_vm6, %v174_v7, %v169_v61  ;;  %v429_v7 = vsub.s32 0, %v880_v29 }
  0xb6   :  { %v227_v34 = vrot.slane %v121_v43, %v180_v56 }
  0xb7   :  { %v102_v60 = vpop.xlane.xlu1 %101  ;;  %v181_v54 = vrot.slane %v113_v42, %v180_v56 }
  0xb8   :  { %v78_v16 = vpop.xlane.xlu0 %77  ;;  %v122_v31 = vmul.f32 0.00390625, %v102_v60 }
  0xb9   :  { %v114_v30 = vmul.f32 0.00390625, %v78_v16  ;;  %v183_v19 = vsel %vm182_vm7, %v181_v54, %v176_v37 }
  0xba   :  { %v232_v50 = vrot.slane %v122_v31, %v187_v59  ;;  %v228_v31 = vsel %vm182_vm7, %v227_v34, %v223_v49 }
  0xbb   :  { %v105_v48 = vpop.xlane.xlu1 %104  ;;  %v188_v58 = vrot.slane %v114_v30, %v187_v59 }
  0xbc   :  { %v123_v28 = vmul.f32 0.00390625, %v105_v48  ;;  %v81_v36 = vpop.xlane.xlu0 %80  ;;  %v233_v56 = vsel %vm189_vm8, %v232_v50, %v228_v31 }
  0xbd   :  { %v115_v47 = vmul.f32 0.00390625, %v81_v36  ;;  %v190_v59 = vsel %vm189_vm8, %v188_v58, %v183_v19 }
  0xbe   :  { %v237_v60 = vrot.slane %v123_v28, %v194_v10 }
  0xbf   :  { %v108_v52 = vpop.xlane.xlu1 %107  ;;  %v195_v55 = vrot.slane %v115_v47, %v194_v10 }
  0xc0   :  { %v124_v43 = vmul.f32 0.00390625, %v108_v52  ;;  %v84_v36 = vpop.xlane.xlu0 %83  ;;  %v238_v62 = vsel %vm196_vm9, %v237_v60, %v233_v56 }
  0xc1   :  { %v116_v42 = vmul.f32 0.00390625, %v84_v36  ;;  %v197_v16 = vsel %vm196_vm9, %v195_v55, %v190_v59  ;;  %v973_v59 = vld [vmem:[#allocation8_spill] sm:$0xff] }
  0xc2   :  { %v242_v30 = vrot.slane %v124_v43, %v201_v23 }
  0xc3   :  { %v202_v63 = vrot.slane %v116_v42, %v201_v23 }
  0xc4   :  { %v243_v35 = vsel %vm203_vm10, %v242_v30, %v238_v62 }
  0xc5   :  { %v204_v40 = vsel %vm203_vm10, %v202_v63, %v197_v16  ;;  %v974_v63 = vld [vmem:[#allocation11_spill] sm:$0xff] }
  0xc6   :  { %v245_v10 = vsel %vm244_vm11, %v243_v35, %v204_v40  ;;  %v975_v35 = vld [vmem:[#allocation12_spill] sm:$0xff]  ;;  %v977_v40 = vld [vmem:[#allocation10_spill] sm:$0xff] }
  0xc7   :  { %604 = vmatmul.mubr.msk.f32.vlgmr.msra.gmra.mrb[0].mxu0 %vm246_vm0, %v245_v10 }
 0x19a   :  { %v318_v41 = vpop.f32.mrb[0].mxu0 }
 0x19b   :  { %v322_v46 = vmax.f32 %v318_v41, 0.0  ;;  %v605_v11 = vpop.f32.mrb[1].mxu0  ;;  %v978_v41 = vld [vmem:[#allocation13_spill] sm:$0xff] }
 0x19c   :  { %v979_v11 = vld [vmem:[#allocation14_spill] sm:$0xff] }
 0x19d   :  { %623 = vmatmul.mubr.msk.f32.vlgmr.msra.gmra.mrb[0].mxu1 %vm323_vm2, %v322_v46 }
 0x270   :  { %v417_v17 = vpop.f32.mrb[0].mxu1 }
 0x271   :  { %v589_v48 = vmul.f32 -1.442695, %v417_v17  ;;  %v624_v3 = vpop.f32.mrb[1].mxu1 }
 0x273   :  { %648 = vpow2.f32 %v589_v48 }
 0x27d   :  { %v649_v22 = vpop.eup %648 }
 0x27e   :  { %v424_v28 = vadd.f32 1.0, %v649_v22 }
 0x280   :  { %650 = vrcp.f32 %v424_v28 }
 0x28a   :  { %v651_v34 = vpop.eup %650 }
 0x28b   :  { %v430_v47 = vrot.slane %v651_v34, %v429_v7  ;;  %v465_v54 = vrot.slane %v651_v34, %v464_v53 }
 0x28d   :  { %436 = vbcast.lane.b32.xlu1 %v430_v47, 264  ;;  %432 = vbcast.lane.b32.xlu0 %v430_v47, 256 }
 0x291   :  { %440 = vbcast.lane.b32.xlu1 %v430_v47, 272  ;;  %448 = vbcast.lane.b32.xlu0 %v430_v47, 288 }
 0x295   :  { %444 = vbcast.lane.b32.xlu1 %v430_v47, 280  ;;  %456 = vbcast.lane.b32.xlu0 %v430_v47, 304 }
 0x299   :  { %452 = vbcast.lane.b32.xlu1 %v430_v47, 296  ;;  %467 = vbcast.lane.b32.xlu0 %v465_v54, 256 }
 0x29d   :  { %460 = vbcast.lane.b32.xlu1 %v430_v47, 312  ;;  %475 = vbcast.lane.b32.xlu0 %v465_v54, 272 }
 0x2a1   :  { %471 = vbcast.lane.b32.xlu1 %v465_v54, 264  ;;  %483 = vbcast.lane.b32.xlu0 %v465_v54, 288 }
 0x2a5   :  { %479 = vbcast.lane.b32.xlu1 %v465_v54, 280  ;;  %491 = vbcast.lane.b32.xlu0 %v465_v54, 304 }
 0x2a9   :  { %487 = vbcast.lane.b32.xlu1 %v465_v54, 296 }
 0x2ad   :  { %495 = vbcast.lane.b32.xlu1 %v465_v54, 312 }
 0x2ff   :  { %v437_v50 = vpop.permute.xlu1 %436  ;;  %v433_v23 = vpop.permute.xlu0 %432 }
 0x300   :  { %v499_v51 = vmul.f32 %v437_v50, %v758_v8  ;;  %v500_v57 = vmul.f32 %v437_v50, %v760_v9  ;;  %v497_v29 = vmul.f32 %v433_v23, %v746_v2  ;;  %v498_v58 = vmul.f32 %v433_v23, %v750_v4 }
 0x302   :  { %531 = vst [vmem:[#allocation5 + $0x10] sm:$0xff] %v499_v51  ;;  %532 = vst [vmem:[#allocation5 + $0x18] sm:$0xff] %v500_v57 }
 0x303   :  { %529 = vst [vmem:[#allocation5] sm:$0xff] %v497_v29  ;;  %530 = vst [vmem:[#allocation5 + $0x8] sm:$0xff] %v498_v58  ;;  %v441_v60 = vpop.permute.xlu1 %440  ;;  %v449_v52 = vpop.permute.xlu0 %448 }
 0x304   :  { %v501_v61 = vmul.f32 %v441_v60, %v770_v14  ;;  %v502_v49 = vmul.f32 %v441_v60, %v772_v15  ;;  %v505_v55 = vmul.f32 %v449_v52, %v794_v26  ;;  %v506_v8 = vmul.f32 %v449_v52, %v796_v27 }
 0x306   :  { %533 = vst [vmem:[#allocation5 + $0x20] sm:$0xff] %v501_v61  ;;  %534 = vst [vmem:[#allocation5 + $0x28] sm:$0xff] %v502_v49 }
 0x307   :  { %537 = vst [vmem:[#allocation5 + $0x40] sm:$0xff] %v505_v55  ;;  %538 = vst [vmem:[#allocation5 + $0x48] sm:$0xff] %v506_v8  ;;  %v445_v2 = vpop.permute.xlu1 %444  ;;  %v457_v4 = vpop.permute.xlu0 %456 }
 0x308   :  { %v503_v9 = vmul.f32 %v445_v2, %v782_v20  ;;  %v504_v43 = vmul.f32 %v445_v2, %v784_v21  ;;  %v509_v36 = vmul.f32 %v457_v4, %v818_v38  ;;  %v510_v14 = vmul.f32 %v457_v4, %v820_v39 }
 0x30a   :  { %535 = vst [vmem:[#allocation5 + $0x30] sm:$0xff] %v503_v9  ;;  %536 = vst [vmem:[#allocation5 + $0x38] sm:$0xff] %v504_v43 }
 0x30b   :  { %541 = vst [vmem:[#allocation5 + $0x60] sm:$0xff] %v509_v36  ;;  %542 = vst [vmem:[#allocation5 + $0x68] sm:$0xff] %v510_v14  ;;  %v453_v15 = vpop.permute.xlu1 %452  ;;  %v468_v26 = vpop.permute.xlu0 %467 }
 0x30c   :  { %v507_v27 = vmul.f32 %v453_v15, %v806_v32  ;;  %v508_v37 = vmul.f32 %v453_v15, %v808_v33  ;;  %v513_v31 = vmul.f32 %v468_v26, %v742_v0  ;;  %v514_v20 = vmul.f32 %v468_v26, %v744_v1 }
 0x30e   :  { %539 = vst [vmem:[#allocation5 + $0x50] sm:$0xff] %v507_v27  ;;  %540 = vst [vmem:[#allocation5 + $0x58] sm:$0xff] %v508_v37 }
 0x30f   :  { %545 = vst [vmem:[#allocation5 + $0x80] sm:$0xff] %v513_v31  ;;  %546 = vst [vmem:[#allocation5 + $0x88] sm:$0xff] %v514_v20  ;;  %v461_v21 = vpop.permute.xlu1 %460  ;;  %v476_v38 = vpop.permute.xlu0 %475 }
 0x310   :  { %v511_v39 = vmul.f32 %v461_v21, %v830_v44  ;;  %v512_v42 = vmul.f32 %v461_v21, %v832_v45  ;;  %v517_v19 = vmul.f32 %v476_v38, %v766_v12  ;;  %v518_v32 = vmul.f32 %v476_v38, %v768_v13 }
 0x312   :  { %543 = vst [vmem:[#allocation5 + $0x70] sm:$0xff] %v511_v39  ;;  %544 = vst [vmem:[#allocation5 + $0x78] sm:$0xff] %v512_v42 }
 0x313   :  { %549 = vst [vmem:[#allocation5 + $0xa0] sm:$0xff] %v517_v19  ;;  %550 = vst [vmem:[#allocation5 + $0xa8] sm:$0xff] %v518_v32  ;;  %v472_v0 = vpop.permute.xlu1 %471  ;;  %v484_v1 = vpop.permute.xlu0 %483 }
 0x314   :  { %v515_v33 = vmul.f32 %v472_v0, %v752_v5  ;;  %v516_v56 = vmul.f32 %v472_v0, %v754_v6  ;;  %v521_v30 = vmul.f32 %v484_v1, %v790_v24  ;;  %v522_v44 = vmul.f32 %v484_v1, %v792_v25  ;;  %v976_v24 = vld [vmem:[#allocation9_spill] sm:$0xff] }
 0x316   :  { %547 = vst [vmem:[#allocation5 + $0x90] sm:$0xff] %v515_v33  ;;  %548 = vst [vmem:[#allocation5 + $0x98] sm:$0xff] %v516_v56 }
 0x317   :  { %553 = vst [vmem:[#allocation5 + $0xc0] sm:$0xff] %v521_v30  ;;  %554 = vst [vmem:[#allocation5 + $0xc8] sm:$0xff] %v522_v44  ;;  %v480_v12 = vpop.permute.xlu1 %479  ;;  %v492_v13 = vpop.permute.xlu0 %491 }
 0x318   :  { %v519_v45 = vmul.f32 %v480_v12, %v778_v18  ;;  %v520_v62 = vmul.f32 %v480_v12, %v973_v59  ;;  %v525_v16 = vmul.f32 %v492_v13, %v974_v63  ;;  %v526_v5 = vmul.f32 %v492_v13, %v975_v35 }
 0x31a   :  { %551 = vst [vmem:[#allocation5 + $0xb0] sm:$0xff] %v519_v45  ;;  %552 = vst [vmem:[#allocation5 + $0xb8] sm:$0xff] %v520_v62 }
 0x31b   :  { %557 = vst [vmem:[#allocation5 + $0xe0] sm:$0xff] %v525_v16  ;;  %558 = vst [vmem:[#allocation5 + $0xe8] sm:$0xff] %v526_v5  ;;  %v488_v6 = vpop.permute.xlu1 %487 }
 0x31c   :  { %v523_v25 = vmul.f32 %v488_v6, %v976_v24  ;;  %v524_v10 = vmul.f32 %v488_v6, %v977_v40 }
 0x31e   :  { %555 = vst [vmem:[#allocation5 + $0xd0] sm:$0xff] %v523_v25  ;;  %556 = vst [vmem:[#allocation5 + $0xd8] sm:$0xff] %v524_v10 }
 0x31f   :  { %v496_v18 = vpop.permute.xlu1 %495 }
 0x320   :  { %v527_v46 = vmul.f32 %v496_v18, %v978_v41  ;;  %v528_v17 = vmul.f32 %v496_v18, %v979_v11 }
 0x322   :  { %559 = vst [vmem:[#allocation5 + $0xf0] sm:$0xff] %v527_v46  ;;  %560 = vst [vmem:[#allocation5 + $0xf8] sm:$0xff] %v528_v17 }
 0x323   :  { %685 = shalt.err (!%p682_p12)
}
 0x324   :  { %s686_s19 = scalar_lea.hbm %s956_s3, 4096 }
 0x325   :  { %p687_p13 = scmp.ne.s32.totalorder %s956_s3, %s686_s19  ;;  %p690_p0 = scmp.lt.u32.totalorder %s686_s19, %s956_s3 }
 0x327   :  { %p692_p1 = pnand %p690_p0, %p687_p13 }
 0x329   :  { %695 = shalt.err (!%p692_p1)
}
 0x32a   :  { %572 = dma.vmem_to_hbm [thread:$0]  %s567_s15, 4096, %s956_s3, [#allocation4], %s701_s22, %s701_s22, %s702_s23  }
 0x32b   :  { %698 = dma.done.wait [#allocation4], 4096  }
 0x32c   :  { %699 = vsyncadd [#allocation4], 4294963200 }
 0x32d   :  { %576 = vsyncpa [#allocation3], 1 }
 0x32e   :  { %577 = vsyncpa [#allocation4], 1 }

</bundles_post_ra>
